<compile_context>
chip_gen: v5e
topology: v5e:2x2
jax: 0.10.0
libtpu: 0.0.40
codegen_flags: <defaults>
</compile_context>

<pallas_src>
from functools import partial

import jax
import jax.numpy as jnp
from jax.experimental import pallas as pl
from jax.experimental.pallas import tpu as pltpu


def _branched_kernel(x_ref, w_ref, b_ref, s_ref, psi_ref, xfake_ref):
    """Single invocation (no grid) -- all batches & branches at once.

    x_ref    : [C, B*HW]       input (channels on sublanes, batch-major pixels on lanes)
    w_ref    : [nb*C, C]       concatenated per-branch 1x1-conv weights (row = br*C + out_chan)
    b_ref    : [nb*C, 1]       concatenated per-branch biases
    s_ref    : [nb*C, B*HW]    per-(batch, branch) scale, pre-expanded to the Psi layout
    psi_ref  : [nb*C, B*HW]    almost_Psi
    xfake_ref: [C, B*HW]       Aggregate (branch-group sum)
    """
    x = x_ref[...]        # [C, B*HW]
    w = w_ref[...]        # [nb*C, C]
    bias = b_ref[...]     # [nb*C, 1]
    scale = s_ref[...]    # [nb*C, B*HW]

    C = x.shape[0]
    nbC = w.shape[0]
    nb = nbC // C

    # 1x1 conv == per-pixel channel mix.  K = C is tiny -> keep it on the VPU:
    # C broadcast multiply-adds instead of a wasteful K=3 MXU pass.
    acc = w[:, 0:1] * x[0:1, :]                 # [nb*C, B*HW]
    for c in range(1, C):                       # static unroll (C known at trace time)
        acc = acc + w[:, c:c + 1] * x[c:c + 1, :]
    acc = acc + bias                            # bias broadcast along lanes

    # ReLU + per-(batch, branch) scale, single lane-dense store of almost_Psi.
    y = scale * jnp.maximum(acc, 0.0)           # [nb*C, B*HW]
    psi_ref[...] = y

    # Aggregate: x_fake[d, :] = sum_br Psi[br*C + d, :]   (nb-1 VPU adds, one store)
    xf = y[0:C, :]
    for br in range(1, nb):                     # static unroll
        xf = xf + y[br * C:(br + 1) * C, :]
    xfake_ref[...] = xf


@partial(jax.jit, static_argnames=("out_features", "materialize_aux"))
def branched_network_forward(x, s_columnstack, weights, biases,
                             out_features=False, materialize_aux=True):
    """x: [B, C, H, W] (NCHW, like PyTorch); s_columnstack: [B, num_branches];
    weights: [num_branches, C_in, C_out]; biases: [num_branches, C_out]."""
    B, C, H, W = x.shape
    nb = weights.shape[0]
    HW = H * W
    BHW = B * HW

    # ---- layout glue (all tiny / fused under jit) ----------------------------
    # lanes = batch-major pixel blocks, sublanes = channels.
    x_l = jnp.transpose(x, (1, 0, 2, 3)).reshape(C, BHW)                # [C, B*HW]
    # row = br*C + d, col = c  (so that row @ x gives out-channel d of branch br)
    w_cat = jnp.transpose(weights, (0, 2, 1)).reshape(nb * C, C)        # [nb*C, C]
    b_cat = biases.reshape(nb * C, 1)                                   # [nb*C, 1]
    # scale[br*C + d, b*HW + p] = s[b, br]
    s_rows = jnp.repeat(jnp.transpose(s_columnstack), C, axis=0)        # [nb*C, B]
    s_l = jnp.repeat(s_rows, HW, axis=1)                                # [nb*C, B*HW]

    psi_l, xfake_l = pl.pallas_call(
        _branched_kernel,
        out_shape=(
            jax.ShapeDtypeStruct((nb * C, BHW), jnp.float32),   # almost_Psi
            jax.ShapeDtypeStruct((C, BHW), jnp.float32),        # x_fake (aggregated)
        ),
        in_specs=[
            pl.BlockSpec(memory_space=pltpu.MemorySpace.VMEM),  # x
            pl.BlockSpec(memory_space=pltpu.MemorySpace.VMEM),  # fused conv weights
            pl.BlockSpec(memory_space=pltpu.MemorySpace.VMEM),  # fused biases
            pl.BlockSpec(memory_space=pltpu.MemorySpace.VMEM),  # expanded scales
        ],
        out_specs=(
            pl.BlockSpec(memory_space=pltpu.MemorySpace.VMEM),
            pl.BlockSpec(memory_space=pltpu.MemorySpace.VMEM),
        ),
    )(x_l, w_cat, b_cat, s_l)

    # ---- back to the NCHW conventions of the PyTorch module ------------------
    Psi = psi_l.reshape(nb * C, B, H, W).transpose(1, 0, 2, 3)          # [B, nb*C, H, W]
    x_fake = xfake_l.reshape(C, B, H, W).transpose(1, 0, 2, 3)          # [B, C, H, W]

    # Module-spec auxiliary outputs.  Pure HBM traffic the kernel never touches;
    # skip them (materialize_aux=False) when the caller does not consume them.
    if materialize_aux:
        Phi = jnp.tile(x, (1, nb, 1, 1))      # Split: x.repeat([1, nb, 1, 1])
        Res = jnp.zeros_like(x)               # Split: zeros_like(x)
        masks = 0.0 * Psi                     # literal '0 * almost_Psi' (keeps NaN/inf propagation)
    else:
        Phi = None
        Res = None
        masks = None

    if out_features:
        # synthetic sub_network exposes its raw branch outputs as "features"
        features = (Psi,)
        return x_fake, Psi, features, Res, masks
    return x_fake, Psi, Phi, Res, masks


def _reference(x, s, weights, biases):
    """Pure-JAX reference for the synthetic BranchedNetwork forward."""
    B, C, H, W = x.shape
    nb = weights.shape[0]
    xc = jnp.transpose(x, (0, 2, 3, 1))   # [B, H, W, C]
    psis = []
    for b in range(nb):
        y = jnp.einsum('bhwc,cd->bhwd', xc, weights[b]) + biases[b]
        y = s[:, b][:, None, None, None] * jnp.maximum(y, 0.0)
        psis.append(jnp.transpose(y, (0, 3, 1, 2)))
    Psi = jnp.concatenate(psis, axis=1)
    x_fake = sum(psis)
    return x_fake, Psi


if __name__ == "__main__":
    B, C, H, W = 2, 3, 16, 16     # img_channels = 3 (module default)
    num_branches = 3

    key = jax.random.PRNGKey(0)
    k_x, k_s, k_w, k_b = jax.random.split(key, 4)
    x = jax.random.normal(k_x, (B, C, H, W), dtype=jnp.float32)
    s_columnstack = 0.5 + jax.random.uniform(k_s, (B, num_branches), dtype=jnp.float32)
    weights = 0.5 * jax.random.normal(k_w, (num_branches, C, C), dtype=jnp.float32)
    biases = 0.1 * jax.random.normal(k_b, (num_branches, C), dtype=jnp.float32)

    outs = branched_network_forward(x, s_columnstack, weights, biases)
    outs = jax.block_until_ready(outs)
    x_fake, Psi, Phi, Res, masks = outs

    # sanity-check against pure-JAX reference
    xf_ref, psi_ref = _reference(x, s_columnstack, weights, biases)
    assert jnp.allclose(x_fake, xf_ref, atol=1e-5, rtol=1e-5)
    assert jnp.allclose(Psi, psi_ref, atol=1e-5, rtol=1e-5)
    assert Phi.shape == (B, num_branches * C, H, W)
    assert jnp.allclose(Phi, jnp.tile(x, (1, num_branches, 1, 1)))
    assert Res.shape == x.shape and float(jnp.abs(Res).max()) == 0.0
    assert masks.shape == Psi.shape and float(jnp.abs(masks).max()) == 0.0

    print("KERNEL_OK")
</pallas_src>

<mosaic_0001>
module attributes {stable_mosaic.version = 11 : i64} {
  func.func @_branched_kernel(%arg0: memref<3x512xf32, #tpu.memory_space<vmem>>, %arg1: memref<9x3xf32, #tpu.memory_space<vmem>>, %arg2: memref<9x1xf32, #tpu.memory_space<vmem>>, %arg3: memref<9x512xf32, #tpu.memory_space<vmem>>, %arg4: memref<9x512xf32, #tpu.memory_space<vmem>>, %arg5: memref<3x512xf32, #tpu.memory_space<vmem>>) attributes {dimension_semantics = [], scalar_prefetch = 0 : i64, scratch_operands = 0 : i64, tpu.core_type = #tpu.core_type<tc>} {
    %c0 = arith.constant 0 : index
    %c0_0 = arith.constant 0 : index
    %0 = vector.load %arg0[%c0, %c0_0] : memref<3x512xf32, #tpu.memory_space<vmem>>, vector<3x512xf32>
    %c0_1 = arith.constant 0 : index
    %c0_2 = arith.constant 0 : index
    %1 = vector.load %arg1[%c0_1, %c0_2] : memref<9x3xf32, #tpu.memory_space<vmem>>, vector<9x3xf32>
    %c0_3 = arith.constant 0 : index
    %c0_4 = arith.constant 0 : index
    %2 = vector.load %arg2[%c0_3, %c0_4] : memref<9x1xf32, #tpu.memory_space<vmem>>, vector<9x1xf32>
    %c0_5 = arith.constant 0 : index
    %c0_6 = arith.constant 0 : index
    %3 = vector.load %arg3[%c0_5, %c0_6] : memref<9x512xf32, #tpu.memory_space<vmem>>, vector<9x512xf32>
    %4 = vector.extract_strided_slice %1 {offsets = [0, 0], sizes = [9, 1], strides = [1, 1]} : vector<9x3xf32> to vector<9x1xf32>
    %5 = vector.extract_strided_slice %0 {offsets = [0, 0], sizes = [1, 512], strides = [1, 1]} : vector<3x512xf32> to vector<1x512xf32>
    %6 = vector.broadcast %4 : vector<9x1xf32> to vector<9x512xf32>
    %7 = vector.broadcast %5 : vector<1x512xf32> to vector<9x512xf32>
    %8 = arith.mulf %6, %7 : vector<9x512xf32>
    %9 = vector.extract_strided_slice %1 {offsets = [0, 1], sizes = [9, 1], strides = [1, 1]} : vector<9x3xf32> to vector<9x1xf32>
    %10 = vector.extract_strided_slice %0 {offsets = [1, 0], sizes = [1, 512], strides = [1, 1]} : vector<3x512xf32> to vector<1x512xf32>
    %11 = vector.broadcast %9 : vector<9x1xf32> to vector<9x512xf32>
    %12 = vector.broadcast %10 : vector<1x512xf32> to vector<9x512xf32>
    %13 = arith.mulf %11, %12 : vector<9x512xf32>
    %14 = arith.addf %8, %13 : vector<9x512xf32>
    %15 = vector.extract_strided_slice %1 {offsets = [0, 2], sizes = [9, 1], strides = [1, 1]} : vector<9x3xf32> to vector<9x1xf32>
    %16 = vector.extract_strided_slice %0 {offsets = [2, 0], sizes = [1, 512], strides = [1, 1]} : vector<3x512xf32> to vector<1x512xf32>
    %17 = vector.broadcast %15 : vector<9x1xf32> to vector<9x512xf32>
    %18 = vector.broadcast %16 : vector<1x512xf32> to vector<9x512xf32>
    %19 = arith.mulf %17, %18 : vector<9x512xf32>
    %20 = arith.addf %14, %19 : vector<9x512xf32>
    %21 = vector.broadcast %2 : vector<9x1xf32> to vector<9x512xf32>
    %22 = arith.addf %20, %21 : vector<9x512xf32>
    %cst = arith.constant 0.000000e+00 : f32
    %23 = vector.broadcast %cst : f32 to vector<9x512xf32>
    %24 = arith.maximumf %22, %23 : vector<9x512xf32>
    %25 = arith.mulf %3, %24 : vector<9x512xf32>
    %c0_7 = arith.constant 0 : index
    %c0_8 = arith.constant 0 : index
    %26 = vector.load %arg4[%c0_7, %c0_8] : memref<9x512xf32, #tpu.memory_space<vmem>>, vector<9x512xf32>
    tpu.vector_store %arg4[%c0_7, %c0_8], %25 {strides = array<i32>} : memref<9x512xf32, #tpu.memory_space<vmem>>, vector<9x512xf32>,
    %27 = vector.extract_strided_slice %25 {offsets = [0, 0], sizes = [3, 512], strides = [1, 1]} : vector<9x512xf32> to vector<3x512xf32>
    %28 = vector.extract_strided_slice %25 {offsets = [3, 0], sizes = [3, 512], strides = [1, 1]} : vector<9x512xf32> to vector<3x512xf32>
    %29 = arith.addf %27, %28 : vector<3x512xf32>
    %30 = vector.extract_strided_slice %25 {offsets = [6, 0], sizes = [3, 512], strides = [1, 1]} : vector<9x512xf32> to vector<3x512xf32>
    %31 = arith.addf %29, %30 : vector<3x512xf32>
    %c0_9 = arith.constant 0 : index
    %c0_10 = arith.constant 0 : index
    %32 = vector.load %arg5[%c0_9, %c0_10] : memref<3x512xf32, #tpu.memory_space<vmem>>, vector<3x512xf32>
    tpu.vector_store %arg5[%c0_9, %c0_10], %31 {strides = array<i32>} : memref<3x512xf32, #tpu.memory_space<vmem>>, vector<3x512xf32>,
    return
  }
}

</mosaic_0001>

<bundles_post_ra>
// kernel: branched_network_forward.1
= control target key start
LH: loop header
LB: loop body
LE: loop exit
PB: predicated region body
PF: predicated region fallthrough
CT: control target
= control target key end

     0   :  { %v252_v0 = vmov 0   ;;  %v253_v3 = vmov 2   ;;  %v254_v4 = vmov 1   ;;  %vm199_vm0 = vcmask 1041408   ;;  %s367_s1 = inlined_call_operand.vmem [shape: f32[9,3], index: 1, kind: input, shape index: {}]   ;;  %s368_s2 = inlined_call_operand.vmem [shape: f32[9,1], index: 2, kind: input, shape index: {}]   ;;  %s369_s0 = inlined_call_operand.vmem [shape: f32[3,512], index: 0, kind: input, shape index: {}]   ;;  %s370_s3 = inlined_call_operand.vmem [shape: f32[9,512], index: 3, kind: input, shape index: {}]   ;;  %s371_s4 = inlined_call_operand.vmem [shape: f32[9,512], index: 4, kind: output, shape index: {0}]   ;;  %s372_s5 = inlined_call_operand.vmem [shape: f32[3,512], index: 5, kind: output, shape index: {1}]  }
   0x1   :  { %246 = vset.pattern.permute.xlu1 %v252_v0  ;;  %244 = vset.pattern.permute.xlu0 %v252_v0  ;;  %v22_v1 = vld [vmem:[%s367_s1 + $0x8] sm:$0x1]  ;;  %v21_v2 = vld [vmem:[%s367_s1] sm:$0xff]  ;;  %vm226_vm1 = vcmask 1043456  }
   0x2   :  { %40 = vperm.xlu1 %246, %v22_v1   ;;  %35 = vperm.xlu0 %244, %v21_v2   ;;  %v23_v5 = vld [vmem:[%s368_s2] sm:$0xff]  ;;  %v24_v6 = vld [vmem:[%s368_s2 + $0x8] sm:$0x1] }
   0x3   :  { %248 = vset.pattern.permute.xlu2 %v253_v3  ;;  %v19_v8 = vld [vmem:[%s369_s0] sm:$0x77]  ;;  %v20_v9 = vld [vmem:[%s369_s0 + $0x8] sm:$0x77] }
   0x4   :  { %102 = vperm.xlu2 %248, %v21_v2   ;;  %v109_v10 = vperm.slane %v19_v8, 2  ;;  %v110_v11 = vperm.slane %v19_v8, 6  ;;  %v111_v12 = vperm.slane %v20_v9, 2  ;;  %v112_v13 = vperm.slane %v20_v9, 6 }
   0x5   :  { %v45_v16 = vperm.slane %v19_v8, 0  ;;  %v46_v17 = vperm.slane %v19_v8, 4  ;;  %v47_v18 = vperm.slane %v20_v9, 0  ;;  %v48_v19 = vperm.slane %v20_v9, 4 }
   0x6   :  { %v73_v20 = vperm.slane %v19_v8, 1  ;;  %v74_v21 = vperm.slane %v19_v8, 5  ;;  %v75_v22 = vperm.slane %v20_v9, 1  ;;  %v76_v23 = vperm.slane %v20_v9, 5 }
   0x7   :  { %v117_v24 = vperm.slane %v109_v10, 2  ;;  %v118_v25 = vperm.slane %v110_v11, 2  ;;  %v119_v26 = vperm.slane %v111_v12, 2  ;;  %v120_v27 = vperm.slane %v112_v13, 2  ;;  %v29_v13 = vld [vmem:[%s370_s3 + $0x20] sm:$0x1] }
   0x8   :  { %v53_v28 = vperm.slane %v45_v16, 0  ;;  %v54_v29 = vperm.slane %v46_v17, 0  ;;  %v55_v30 = vperm.slane %v47_v18, 0  ;;  %v56_v31 = vperm.slane %v48_v19, 0  ;;  %v30_v18 = vld [vmem:[%s370_s3 + $0x28] sm:$0x1] }
   0x9   :  { %v81_v33 = vperm.slane %v73_v20, 1  ;;  %v82_v34 = vperm.slane %v74_v21, 1  ;;  %v83_v35 = vperm.slane %v75_v22, 1  ;;  %v84_v36 = vperm.slane %v76_v23, 1  ;;  %v31_v19 = vld [vmem:[%s370_s3 + $0x30] sm:$0x1] }
   0xa   :  { %247 = vset.pattern.permute.xlu1 %v254_v4  ;;  %245 = vset.pattern.permute.xlu0 %v254_v4 }
   0xb   :  { %70 = vperm.xlu1 %247, %v22_v1   ;;  %66 = vperm.xlu0 %245, %v21_v2  }
   0xc   :  { %106 = vperm.xlu2 %248, %v22_v1  }
  0x13   :  { %249 = vset.pattern.permute.xlu1 %v252_v0  ;;  %251 = vset.pattern.permute.xlu0 %v252_v0 }
  0x14   :  { %139 = vperm.xlu1 %249, %v23_v5   ;;  %250 = vset.pattern.permute.xlu2 %v252_v0 }
  0x15   :  { %144 = vperm.xlu2 %250, %v24_v6  }
  0x5e   :  { %v297_v7 = vpop.permute.xlu2 %102 }
  0x5f   :  { %v121_v9 = vmul.f32 %v117_v24, %v297_v7  ;;  %v122_v10 = vmul.f32 %v118_v25, %v297_v7  ;;  %v123_v11 = vmul.f32 %v119_v26, %v297_v7  ;;  %v124_v12 = vmul.f32 %v120_v27, %v297_v7  ;;  %v32_v7 = vld [vmem:[%s370_s3 + $0x38] sm:$0x1] }
  0x66   :  { %v107_v32 = vpop.permute.xlu2 %106 }
  0x67   :  { %v125_v37 = vmul.f32 %v117_v24, %v107_v32  ;;  %v126_v38 = vmul.f32 %v118_v25, %v107_v32  ;;  %v127_v39 = vmul.f32 %v119_v26, %v107_v32  ;;  %v128_v40 = vmul.f32 %v120_v27, %v107_v32 }
  0x6f   :  { %v145_v3 = vpop.permute.xlu2 %144 }
  0x74   :  { %v41_v14 = vpop.permute.xlu1 %40  ;;  %v36_v15 = vpop.permute.xlu0 %35 }
  0x75   :  { %v61_v41 = vmul.f32 %v53_v28, %v41_v14  ;;  %v62_v42 = vmul.f32 %v54_v29, %v41_v14  ;;  %v63_v43 = vmul.f32 %v55_v30, %v41_v14  ;;  %v64_v44 = vmul.f32 %v56_v31, %v41_v14 }
  0x76   :  { %v57_v55 = vmul.f32 %v53_v28, %v36_v15  ;;  %v58_v56 = vmul.f32 %v54_v29, %v36_v15  ;;  %v59_v57 = vmul.f32 %v55_v30, %v36_v15  ;;  %v60_v58 = vmul.f32 %v56_v31, %v36_v15  ;;  %v25_v29 = vld [vmem:[%s370_s3] sm:$0xff] }
  0x7d   :  { %v71_v45 = vpop.permute.xlu1 %70  ;;  %v67_v46 = vpop.permute.xlu0 %66 }
  0x7e   :  { %v85_v47 = vmul.f32 %v81_v33, %v67_v46  ;;  %v86_v48 = vmul.f32 %v82_v34, %v67_v46  ;;  %v87_v49 = vmul.f32 %v83_v35, %v67_v46  ;;  %v88_v50 = vmul.f32 %v84_v36, %v67_v46 }
  0x7f   :  { %v89_v51 = vmul.f32 %v81_v33, %v71_v45  ;;  %v90_v52 = vmul.f32 %v82_v34, %v71_v45  ;;  %v91_v53 = vmul.f32 %v83_v35, %v71_v45  ;;  %v92_v54 = vmul.f32 %v84_v36, %v71_v45 }
  0x80   :  { %v93_v63 = vadd.f32 %v85_v47, %v57_v55  ;;  %v94_v0 = vadd.f32 %v86_v48, %v58_v56  ;;  %v95_v1 = vadd.f32 %v87_v49, %v59_v57  ;;  %v96_v2 = vadd.f32 %v88_v50, %v60_v58 }
  0x81   :  { %v97_v59 = vadd.f32 %v89_v51, %v61_v41  ;;  %v98_v60 = vadd.f32 %v90_v52, %v62_v42  ;;  %v99_v61 = vadd.f32 %v91_v53, %v63_v43  ;;  %v100_v62 = vadd.f32 %v92_v54, %v64_v44 }
  0x82   :  { %v129_v21 = vadd.f32 %v121_v9, %v93_v63  ;;  %v130_v22 = vadd.f32 %v122_v10, %v94_v0  ;;  %v131_v23 = vadd.f32 %v123_v11, %v95_v1  ;;  %v132_v24 = vadd.f32 %v124_v12, %v96_v2 }
  0x83   :  { %v133_v4 = vadd.f32 %v125_v37, %v97_v59  ;;  %v134_v5 = vadd.f32 %v126_v38, %v98_v60  ;;  %v135_v6 = vadd.f32 %v127_v39, %v99_v61  ;;  %v136_v8 = vadd.f32 %v128_v40, %v100_v62  ;;  %v26_v38 = vld [vmem:[%s370_s3 + $0x8] sm:$0xff]  ;;  %v27_v39 = vld [vmem:[%s370_s3 + $0x10] sm:$0xff]  ;;  %v28_v40 = vld [vmem:[%s370_s3 + $0x18] sm:$0xff] }
  0x85   :  { %v151_v14 = vadd.f32 %v145_v3, %v133_v4  ;;  %v152_v15 = vadd.f32 %v145_v3, %v134_v5  ;;  %v153_v16 = vadd.f32 %v145_v3, %v135_v6  ;;  %v154_v17 = vadd.f32 %v145_v3, %v136_v8 }
  0x86   :  { %v140_v20 = vpop.permute.xlu1 %139 }
  0x87   :  { %v159_v25 = vmax.f32 %v151_v14, 0.0  ;;  %v160_v26 = vmax.f32 %v152_v15, 0.0  ;;  %v161_v27 = vmax.f32 %v153_v16, 0.0  ;;  %v162_v28 = vmax.f32 %v154_v17, 0.0 }
  0x88   :  { %v147_v30 = vadd.f32 %v140_v20, %v129_v21  ;;  %v148_v31 = vadd.f32 %v140_v20, %v130_v22  ;;  %v149_v32 = vadd.f32 %v140_v20, %v131_v23  ;;  %v150_v33 = vadd.f32 %v140_v20, %v132_v24 }
  0x89   :  { %v167_v34 = vmul.f32 %v159_v25, %v29_v13  ;;  %v168_v35 = vmul.f32 %v160_v26, %v30_v18  ;;  %v169_v36 = vmul.f32 %v161_v27, %v31_v19  ;;  %v170_v37 = vmul.f32 %v162_v28, %v32_v7 }
  0x8a   :  { %v155_v41 = vmax.f32 %v147_v30, 0.0  ;;  %v156_v42 = vmax.f32 %v148_v31, 0.0  ;;  %v157_v43 = vmax.f32 %v149_v32, 0.0  ;;  %v158_v44 = vmax.f32 %v150_v33, 0.0 }
  0x8b   :  { %175 = vst [vmem:[%s371_s4 + $0x20] sm:$0x1] %v167_v34  ;;  %v201_v49 = vrot.slane %v167_v34, 6  ;;  %v204_v50 = vrot.slane %v168_v35, 6  ;;  %v207_v51 = vrot.slane %v169_v36, 6  ;;  %v210_v52 = vrot.slane %v170_v37, 6 }
  0x8c   :  { %176 = vst [vmem:[%s371_s4 + $0x28] sm:$0x1] %v168_v35  ;;  %v163_v45 = vmul.f32 %v155_v41, %v25_v29  ;;  %v164_v46 = vmul.f32 %v156_v42, %v26_v38  ;;  %v165_v47 = vmul.f32 %v157_v43, %v27_v39  ;;  %v166_v48 = vmul.f32 %v158_v44, %v28_v40 }
  0x8d   :  { %177 = vst [vmem:[%s371_s4 + $0x30] sm:$0x1] %v169_v36 }
  0x8e   :  { %178 = vst [vmem:[%s371_s4 + $0x38] sm:$0x1] %v170_v37  ;;  %v183_v53 = vrot.slane %v163_v45, 3  ;;  %v184_v54 = vrot.slane %v164_v46, 3  ;;  %v185_v55 = vrot.slane %v165_v47, 3  ;;  %v186_v56 = vrot.slane %v166_v48, 3 }
  0x8f   :  { %171 = vst [vmem:[%s371_s4] sm:$0xff] %v163_v45  ;;  %v200_v57 = vrot.slane %v163_v45, 6  ;;  %v203_v58 = vrot.slane %v164_v46, 6  ;;  %v206_v59 = vrot.slane %v165_v47, 6  ;;  %v209_v60 = vrot.slane %v166_v48, 6 }
  0x90   :  { %172 = vst [vmem:[%s371_s4 + $0x8] sm:$0xff] %v164_v46  ;;  %v191_v61 = vadd.f32 %v183_v53, %v163_v45  ;;  %v192_v62 = vadd.f32 %v184_v54, %v164_v46  ;;  %v193_v63 = vadd.f32 %v185_v55, %v165_v47  ;;  %v194_v0 = vadd.f32 %v186_v56, %v166_v48 }
  0x91   :  { %173 = vst [vmem:[%s371_s4 + $0x10] sm:$0xff] %v165_v47  ;;  %v202_v1 = vsel %vm199_vm0, %v200_v57, %v201_v49  ;;  %v205_v2 = vsel %vm199_vm0, %v203_v58, %v204_v50  ;;  %v208_v3 = vsel %vm199_vm0, %v206_v59, %v207_v51  ;;  %v211_v4 = vsel %vm199_vm0, %v209_v60, %v210_v52 }
  0x92   :  { %174 = vst [vmem:[%s371_s4 + $0x18] sm:$0xff] %v166_v48  ;;  %v217_v5 = vadd.f32 %v205_v2, %v192_v62  ;;  %v219_v6 = vadd.f32 %v211_v4, %v194_v0  ;;  %v216_v8 = vadd.f32 %v202_v1, %v191_v61  ;;  %v218_v9 = vadd.f32 %v208_v3, %v193_v63 }
  0x94   :  { %v224_v10 = vrot.slane %v217_v5, 4  ;;  %v225_v11 = vrot.slane %v219_v6, 4 }
  0x96   :  { %v227_v12 = vsel %vm226_vm1, %v216_v8, %v224_v10  ;;  %v228_v13 = vsel %vm226_vm1, %v218_v9, %v225_v11 }
  0x97   :  { %231 = vst [vmem:[%s372_s5] sm:$0x77] %v227_v12 }
  0x98   :  { %232 = vst [vmem:[%s372_s5 + $0x8] sm:$0x77] %v228_v13 }

</bundles_post_ra>
